<compile_context>
chip_gen: v6e
topology: v6e:2x2x1
jax: 0.10.0
libtpu: 0.0.40
codegen_flags: <defaults>
</compile_context>

<pallas_src>
import functools

import jax
import jax.numpy as jnp
from jax.experimental import pallas as pl
from jax.experimental.pallas import tpu as pltpu

LANES = 128
SUBLANES = 8
MAX_ROW_TILE = 2048  # (2048, 128) f32 block = 1 MiB per input per buffer


def _modulation(d, gamma):
    g = float(gamma)
    if g == 2.0:
        return d * d                          # single VPU multiply, no pow->exp/log
    if g.is_integer() and g >= 0.0:
        return jax.lax.integer_pow(d, int(g))
    return d ** g


def _focal_elementwise(x, t, gamma):
    # Numerically-stable BCEWithLogitsLoss(reduction='none'):
    #   bce = max(x, 0) - x*t + log1p(exp(-|x|))
    e = jnp.exp(-jnp.abs(x))
    bce = jnp.maximum(x, 0.0) - x * t + jnp.log1p(e)
    pt = jnp.exp(-bce)
    d = jnp.maximum(1.0 - pt, 0.0)            # clamp: pt can round slightly above 1
    return _modulation(d, gamma) * bce


def _focal_partial_sum_kernel(x_ref, t_ref, o_ref, *, n, row_tile, gamma, need_mask):
    x = x_ref[...].astype(jnp.float32)
    t = t_ref[...].astype(jnp.float32)

    if need_mask:
        i = pl.program_id(0)
        row_ids = i * row_tile + jax.lax.broadcasted_iota(jnp.int32, x.shape, 0)
        col_ids = jax.lax.broadcasted_iota(jnp.int32, x.shape, 1)
        full_rows = n // LANES
        rem = n % LANES
        valid = (row_ids < full_rows) | ((row_ids == full_rows) & (col_ids < rem))
        # Zero the inputs BEFORE exp/log1p so out-of-bounds garbage in the last
        # ragged block cannot generate Inf/NaN that poisons the masked sum.
        x = jnp.where(valid, x, 0.0)
        t = jnp.where(valid, t, 0.0)

    focal = _focal_elementwise(x, t, gamma)
    if need_mask:
        focal = jnp.where(valid, focal, 0.0)

    # Fold the (row_tile, 128) tile into one (8, 128) block of partial sums
    # (pure VPU vreg adds; the (8,128) minor tile is preserved by the reshape);
    # the cross-lane reduce happens once, in the wrapper.
    o_ref[...] = jnp.sum(
        focal.reshape(row_tile // SUBLANES, SUBLANES, LANES), axis=0
    )


def _focal_none_kernel(x_ref, t_ref, o_ref, *, gamma, alpha):
    x = x_ref[...].astype(jnp.float32)
    t = t_ref[...].astype(jnp.float32)
    focal = float(alpha) * _focal_elementwise(x, t, gamma)
    o_ref[...] = focal.astype(o_ref.dtype)


def _to_slab(arr, n):
    """Flatten to a (rows, 128) lane-aligned slab, padding only the tail."""
    rows = max(-(-n // LANES), SUBLANES)
    n_slab = rows * LANES
    flat = arr.reshape(-1)
    if n_slab != n:
        flat = jnp.pad(flat, (0, n_slab - n))
    return flat.reshape(rows, LANES), rows


def binary_focal_loss(inputs, targets, alpha=1.0, gamma=2.0, reduction="mean"):
    """JAX/Pallas equivalent of BinaryFocalLoss.forward (logits + targets)."""
    assert inputs.shape == targets.shape
    n = int(inputs.size)
    assert n > 0

    x2, rows = _to_slab(inputs, n)
    t2, _ = _to_slab(targets, n)

    # Largest multiple-of-8 row tile <= min(rows, MAX_ROW_TILE); ragged last
    # blocks are masked in-kernel (reductions) or have their writes dropped
    # by Pallas (elementwise) instead of being padded in HBM.
    row_tile = min(MAX_ROW_TILE, (rows // SUBLANES) * SUBLANES)
    num_tiles = -(-rows // row_tile)

    in_specs = [
        pl.BlockSpec((row_tile, LANES), lambda i: (i, 0)),
        pl.BlockSpec((row_tile, LANES), lambda i: (i, 0)),
    ]
    cparams = pltpu.CompilerParams(dimension_semantics=("parallel",))

    if reduction in ("mean", "sum"):
        need_mask = (num_tiles * row_tile * LANES) != n
        kernel = functools.partial(
            _focal_partial_sum_kernel,
            n=n, row_tile=row_tile, gamma=float(gamma), need_mask=need_mask,
        )
        partials = pl.pallas_call(
            kernel,
            out_shape=jax.ShapeDtypeStruct((num_tiles * SUBLANES, LANES), jnp.float32),
            grid_spec=pltpu.PrefetchScalarGridSpec(
                num_scalar_prefetch=0,
                grid=(num_tiles,),
                in_specs=in_specs,
                out_specs=pl.BlockSpec((SUBLANES, LANES), lambda i: (i, 0)),
            ),
            compiler_params=cparams,
        )(x2, t2)
        total = float(alpha) * jnp.sum(partials)
        if reduction == "mean":
            return total / jnp.float32(n)
        return total

    # reduction == 'none': elementwise focal loss, original shape and dtype.
    kernel = functools.partial(
        _focal_none_kernel, gamma=float(gamma), alpha=float(alpha)
    )
    slab = pl.pallas_call(
        kernel,
        out_shape=jax.ShapeDtypeStruct((rows, LANES), inputs.dtype),
        grid_spec=pltpu.PrefetchScalarGridSpec(
            num_scalar_prefetch=0,
            grid=(num_tiles,),
            in_specs=in_specs,
            out_specs=pl.BlockSpec((row_tile, LANES), lambda i: (i, 0)),
        ),
        compiler_params=cparams,
    )(x2, t2)
    return slab.reshape(-1)[:n].reshape(inputs.shape)


# ----------------------------- pure-JAX reference ----------------------------
def _focal_ref_elementwise(inputs, targets, alpha, gamma):
    x = inputs.astype(jnp.float32)
    t = targets.astype(jnp.float32)
    bce = jnp.maximum(x, 0.0) - x * t + jnp.log1p(jnp.exp(-jnp.abs(x)))
    pt = jnp.exp(-bce)
    return alpha * (1.0 - pt) ** gamma * bce


def binary_focal_loss_ref(inputs, targets, alpha=1.0, gamma=2.0, reduction="mean"):
    focal = _focal_ref_elementwise(inputs, targets, alpha, gamma)
    if reduction == "mean":
        return jnp.mean(focal)
    if reduction == "sum":
        return jnp.sum(focal)
    return focal


if __name__ == "__main__":
    key = jax.random.PRNGKey(0)
    k1, k2, k3, k4 = jax.random.split(key, 4)

    # Typical NCHW logits/targets pair for a binary segmentation head.
    shape = (2, 4, 16, 16)
    logits = jax.random.normal(k1, shape, dtype=jnp.float32)
    targets = (jax.random.uniform(k2, shape) > 0.5).astype(jnp.float32)

    out = jax.block_until_ready(
        binary_focal_loss(logits, targets, alpha=1.0, gamma=2.0, reduction="mean")
    )
    ref = binary_focal_loss_ref(logits, targets, reduction="mean")
    assert jnp.allclose(out, ref, rtol=1e-5, atol=1e-6), (out, ref)

    out_sum = jax.block_until_ready(
        binary_focal_loss(logits, targets, alpha=0.25, gamma=2.0, reduction="sum")
    )
    ref_sum = binary_focal_loss_ref(logits, targets, alpha=0.25, reduction="sum")
    assert jnp.allclose(out_sum, ref_sum, rtol=1e-5, atol=1e-4), (out_sum, ref_sum)

    # Non-lane-aligned shape exercising the ragged-tail mask / OOB-block paths.
    shape2 = (3, 5, 7, 11)
    logits2 = jax.random.normal(k3, shape2, dtype=jnp.float32)
    targets2 = (jax.random.uniform(k4, shape2) > 0.5).astype(jnp.float32)

    out2 = jax.block_until_ready(
        binary_focal_loss(logits2, targets2, alpha=1.0, gamma=2.0, reduction="mean")
    )
    ref2 = binary_focal_loss_ref(logits2, targets2, reduction="mean")
    assert jnp.allclose(out2, ref2, rtol=1e-5, atol=1e-6), (out2, ref2)

    out_none = jax.block_until_ready(
        binary_focal_loss(logits2, targets2, alpha=0.5, gamma=2.0, reduction="none")
    )
    ref_none = binary_focal_loss_ref(logits2, targets2, alpha=0.5, reduction="none")
    assert out_none.shape == shape2
    assert jnp.allclose(out_none, ref_none, rtol=1e-5, atol=1e-6)

    print("KERNEL_OK")
</pallas_src>

<mosaic_0001>
module attributes {stable_mosaic.version = 11 : i64} {
  func.func @_focal_partial_sum_kernel(%arg0: i32, %arg1: memref<16x128xf32, #tpu.memory_space<vmem>>, %arg2: memref<16x128xf32, #tpu.memory_space<vmem>>, %arg3: memref<8x128xf32, #tpu.memory_space<vmem>>) attributes {dimension_semantics = [#tpu.dimension_semantics<parallel>], iteration_bounds = array<i64: 1>, scalar_prefetch = 0 : i64, scratch_operands = 0 : i64, tpu.core_type = #tpu.core_type<tc>, window_params = [{transform_indices = @transform_0, window_bounds = array<i64: 16, 128>}, {transform_indices = @transform_1, window_bounds = array<i64: 16, 128>}, {transform_indices = @transform_2, window_bounds = array<i64: 8, 128>}]} {
    %c0 = arith.constant 0 : index
    %c0_0 = arith.constant 0 : index
    %0 = vector.load %arg1[%c0, %c0_0] : memref<16x128xf32, #tpu.memory_space<vmem>>, vector<16x128xf32>
    %c0_1 = arith.constant 0 : index
    %c0_2 = arith.constant 0 : index
    %1 = vector.load %arg2[%c0_1, %c0_2] : memref<16x128xf32, #tpu.memory_space<vmem>>, vector<16x128xf32>
    %2 = math.absf %0 : vector<16x128xf32>
    %cst = arith.constant 0.000000e+00 : f32
    %3 = vector.broadcast %cst : f32 to vector<16x128xf32>
    %4 = arith.subf %3, %2 : vector<16x128xf32>
    %5 = math.exp %4 : vector<16x128xf32>
    %cst_3 = arith.constant 0.000000e+00 : f32
    %6 = vector.broadcast %cst_3 : f32 to vector<16x128xf32>
    %7 = arith.maximumf %0, %6 : vector<16x128xf32>
    %8 = arith.mulf %0, %1 : vector<16x128xf32>
    %9 = arith.subf %7, %8 : vector<16x128xf32>
    %10 = math.log1p %5 : vector<16x128xf32>
    %11 = arith.addf %9, %10 : vector<16x128xf32>
    %cst_4 = arith.constant 0.000000e+00 : f32
    %12 = vector.broadcast %cst_4 : f32 to vector<16x128xf32>
    %13 = arith.subf %12, %11 : vector<16x128xf32>
    %14 = math.exp %13 : vector<16x128xf32>
    %cst_5 = arith.constant 1.000000e+00 : f32
    %15 = vector.broadcast %cst_5 : f32 to vector<16x128xf32>
    %16 = arith.subf %15, %14 : vector<16x128xf32>
    %cst_6 = arith.constant 0.000000e+00 : f32
    %17 = vector.broadcast %cst_6 : f32 to vector<16x128xf32>
    %18 = arith.maximumf %16, %17 : vector<16x128xf32>
    %19 = arith.mulf %18, %18 : vector<16x128xf32>
    %20 = arith.mulf %19, %11 : vector<16x128xf32>
    %21 = vector.shape_cast %20 : vector<16x128xf32> to vector<2x8x128xf32>
    %cst_7 = arith.constant dense<0.000000e+00> : vector<8x128xf32>
    %22 = vector.multi_reduction <add>, %21, %cst_7 [0] : vector<2x8x128xf32> to vector<8x128xf32>
    %c0_8 = arith.constant 0 : index
    %c0_9 = arith.constant 0 : index
    %23 = vector.load %arg3[%c0_8, %c0_9] : memref<8x128xf32, #tpu.memory_space<vmem>>, vector<8x128xf32>
    tpu.vector_store %arg3[%c0_8, %c0_9], %22 {strides = array<i32>} : memref<8x128xf32, #tpu.memory_space<vmem>>, vector<8x128xf32>,
    return
  }
  func.func @transform_0(%arg0: i32) -> (i32, i32) {
    %c0_i32 = arith.constant 0 : i32
    %c0_i32_0 = arith.constant 0 : i32
    return %arg0, %c0_i32 : i32, i32
  }
  func.func @transform_1(%arg0: i32) -> (i32, i32) {
    %c0_i32 = arith.constant 0 : i32
    %c0_i32_0 = arith.constant 0 : i32
    return %arg0, %c0_i32 : i32, i32
  }
  func.func @transform_2(%arg0: i32) -> (i32, i32) {
    %c0_i32 = arith.constant 0 : i32
    %c0_i32_0 = arith.constant 0 : i32
    return %arg0, %c0_i32 : i32, i32
  }
}

</mosaic_0001>

<bundles_post_ra>
// kernel: tpu_custom_call.1
= control target key start
LH: loop header
LB: loop body
LE: loop exit
PB: predicated region body
PF: predicated region fallthrough
CT: control target
= control target key end

     0   :  { %7 = vsyncpa [#allocation3], 0  ;;  %s222_s0 = inlined_call_operand.hbm [shape: f32[16,128], index: 0, kind: input, shape index: {}]   ;;  %s223_s1 = inlined_call_operand.hbm [shape: f32[16,128], index: 1, kind: input, shape index: {}]   ;;  %s224_s2 = inlined_call_operand.hbm [shape: f32[8,128], index: 2, kind: output, shape index: {}]  }
   0x1   :  { %8 = vsyncpa [#allocation6], 0 }
   0x2   :  { %9 = vsyncpa [#allocation4], 0  ;;  %s193_s9 = smov [#allocation2]  }
   0x3   :  { %s15_s10 = sshll.u32 %s193_s9, 4  ;;  %s16_s10 = int_to_ptr.vmem [resolvable:$true] %s15_s10 }
   0x4   :  { %s135_s11 = scalar_lea.vmem %s16_s10, 256  ;;  %p140_p1 = scmp.lt.s32.totalorder %s16_s10, %s16_s10 }
   0x5   :  { %p136_p0 = scmp.ne.s32.totalorder %s16_s10, %s135_s11  ;;  %p141_p2 = scmp.lt.s32.totalorder %s135_s11, %s135_s11 }
   0x7   :  { %p142_p3 = por %p141_p2, %p140_p1 }
   0x9   :  { %p143_p4 = pnand %p142_p3, %p136_p0 }
   0xb   :  { %146 = shalt.err (!%p143_p4)
}
   0xc   :  { %s194_s12 = smov 128   ;;  %s195_s13 = smov 8  }
   0xd   :  { %21 = dma.hbm_to_vmem [thread:$0]  %s222_s0, 256, %s16_s10, [#allocation3], %s194_s12, %s194_s12, %s195_s13  }
   0xe   :  { %s196_s16 = smov [#allocation5]  }
   0xf   :  { %s27_s17 = sshll.u32 %s196_s16, 4  ;;  %s28_s17 = int_to_ptr.vmem [resolvable:$true] %s27_s17 }
  0x10   :  { %s155_s18 = scalar_lea.vmem %s28_s17, 256  ;;  %p160_p6 = scmp.lt.s32.totalorder %s28_s17, %s28_s17 }
  0x11   :  { %p156_p5 = scmp.ne.s32.totalorder %s28_s17, %s155_s18  ;;  %p161_p7 = scmp.lt.s32.totalorder %s155_s18, %s155_s18 }
  0x13   :  { %p162_p8 = por %p161_p7, %p160_p6 }
  0x15   :  { %p163_p9 = pnand %p162_p8, %p156_p5 }
  0x17   :  { %166 = shalt.err (!%p163_p9)
}
  0x18   :  { %33 = dma.hbm_to_vmem [thread:$0]  %s223_s1, 256, %s28_s17, [#allocation6], %s194_s12, %s194_s12, %s195_s13  }
  0x19   :  { %187 = dma.done.wait [#allocation3], 256  }
  0x1a   :  { %188 = vsyncadd [#allocation3], 4294967040 }
  0x1b   :  { %189 = dma.done.wait [#allocation6], 256  }
  0x1c   :  { %190 = vsyncadd [#allocation6], 4294967040  ;;  %v40_v0 = vld [vmem:[#allocation2] sm:$0xff]  ;;  %v41_v1 = vld [vmem:[#allocation2 + $0x8] sm:$0xff]  ;;  %s197_s0 = smov [#allocation7]  }
  0x1d   :  { %v44_v2 = vand.u32 2147483647, %v40_v0  ;;  %v45_v3 = vand.u32 2147483647, %v41_v1  ;;  %v42_v14 = vld [vmem:[#allocation5] sm:$0xff]  ;;  %v43_v15 = vld [vmem:[#allocation5 + $0x8] sm:$0xff] }
  0x1e   :  { %v52_v17 = vmax.f32 %v40_v0, 0.0  ;;  %v54_v18 = vmul.f32 %v42_v14, %v40_v0  ;;  %v53_v21 = vmax.f32 %v41_v1, 0.0  ;;  %v55_v22 = vmul.f32 %v43_v15, %v41_v1  ;;  %s100_s1 = sshll.u32 %s197_s0, 4  ;;  %s101_s1 = int_to_ptr.vmem [resolvable:$true] %s100_s1 }
  0x1f   :  { %v46_v4 = vsub.f32 0.0, %v44_v2  ;;  %v47_v5 = vsub.f32 0.0, %v45_v3  ;;  %s167_s21 = scalar_lea.vmem %s101_s1, 128  ;;  %p172_p11 = scmp.lt.s32.totalorder %s101_s1, %s101_s1 }
  0x20   :  { %v56_v26 = vsub.f32 %v52_v17, %v54_v18  ;;  %v57_v29 = vsub.f32 %v53_v21, %v55_v22  ;;  %p168_p10 = scmp.ne.s32.totalorder %s101_s1, %s167_s21  ;;  %p173_p12 = scmp.lt.s32.totalorder %s167_s21, %s167_s21 }
  0x21   :  { %v48_v6 = vmul.f32 1.442695, %v46_v4  ;;  %v50_v7 = vmul.f32 1.442695, %v47_v5 }
  0x22   :  { %p174_p13 = por %p173_p12, %p172_p11 }
  0x23   :  { %115 = vpow2.f32 %v48_v6 }
  0x24   :  { %117 = vpow2.f32 %v50_v7  ;;  %p175_p0 = pnand %p174_p13, %p168_p10 }
  0x30   :  { %v116_v8 = vpop.eup %115 }
  0x31   :  { %v118_v9 = vpop.eup %117  ;;  %v58_v10 = vadd.f32 1.0, %v116_v8  ;;  %v61_v12 = vmul.f32 -0.5, %v116_v8  ;;  %v64_v19 = vand.u32 2147483647, %v116_v8 }
  0x32   :  { %v67_v11 = vadd.f32 1.0, %v118_v9  ;;  %v70_v13 = vmul.f32 -0.5, %v118_v9  ;;  %v73_v23 = vand.u32 2147483647, %v118_v9 }
  0x33   :  { %119 = vlog2.f32 %v58_v10  ;;  %v62_v16 = vadd.f32 1.0, %v61_v12  ;;  %vm65_vm0 = vcmp.lt.f32.partialorder %v64_v19, 0.0004427343 }
  0x34   :  { %121 = vlog2.f32 %v67_v11  ;;  %v71_v20 = vadd.f32 1.0, %v70_v13  ;;  %vm74_vm1 = vcmp.lt.f32.partialorder %v73_v23, 0.0004427343 }
  0x35   :  { %v63_v24 = vmul.f32 %v116_v8, %v62_v16 }
  0x36   :  { %v72_v27 = vmul.f32 %v118_v9, %v71_v20 }
  0x40   :  { %v120_v25 = vpop.eup %119 }
  0x41   :  { %v122_v28 = vpop.eup %121  ;;  %v60_v30 = vmul.f32 0.6931472, %v120_v25 }
  0x42   :  { %v69_v31 = vmul.f32 0.6931472, %v122_v28 }
  0x43   :  { %v66_v32 = vsel %vm65_vm0, %v63_v24, %v60_v30 }
  0x44   :  { %v75_v33 = vsel %vm74_vm1, %v72_v27, %v69_v31  ;;  %v76_v34 = vadd.f32 %v66_v32, %v56_v26 }
  0x45   :  { %v77_v35 = vadd.f32 %v75_v33, %v57_v29 }
  0x46   :  { %v78_v36 = vsub.f32 0.0, %v76_v34 }
  0x47   :  { %v79_v37 = vsub.f32 0.0, %v77_v35 }
  0x48   :  { %v80_v38 = vmul.f32 1.442695, %v78_v36 }
  0x49   :  { %v82_v39 = vmul.f32 1.442695, %v79_v37 }
  0x4a   :  { %123 = vpow2.f32 %v80_v38 }
  0x4b   :  { %125 = vpow2.f32 %v82_v39 }
  0x57   :  { %v124_v40 = vpop.eup %123 }
  0x58   :  { %v126_v41 = vpop.eup %125  ;;  %v84_v42 = vsub.f32 1.0, %v124_v40 }
  0x59   :  { %v85_v43 = vsub.f32 1.0, %v126_v41 }
  0x5a   :  { %v86_v44 = vmax.f32 %v84_v42, 0.0 }
  0x5b   :  { %v87_v45 = vmax.f32 %v85_v43, 0.0 }
  0x5c   :  { %v88_v46 = vmul.f32 %v86_v44, %v86_v44 }
  0x5d   :  { %v89_v47 = vmul.f32 %v87_v45, %v87_v45 }
  0x5e   :  { %v90_v48 = vmul.f32 %v88_v46, %v76_v34 }
  0x5f   :  { %v91_v49 = vmul.f32 %v89_v47, %v77_v35 }
  0x61   :  { %v92_v50 = vadd.f32 %v91_v49, %v90_v48 }
  0x63   :  { %93 = vst [vmem:[#allocation7] sm:$0xff] %v92_v50 }
  0x64   :  { %178 = shalt.err (!%p175_p0)
}
  0x65   :  { %103 = dma.vmem_to_hbm [thread:$0]  %s101_s1, 128, %s224_s2, [#allocation4]  }
  0x66   :  { %191 = dma.done.wait [#allocation4], 128  }
  0x67   :  { %192 = vsyncadd [#allocation4], 4294967168 }
  0x68   :  { %107 = vsyncpa [#allocation3], 1 }
  0x69   :  { %108 = vsyncpa [#allocation6], 1 }
  0x6a   :  { %109 = vsyncpa [#allocation4], 1 }

</bundles_post_ra>
